<compile_context>
chip_gen: v6e
topology: v6e:2x2x1
jax: 0.10.0
libtpu: 0.0.40
codegen_flags: <defaults>
</compile_context>

<pallas_src>
import jax
import jax.numpy as jnp
from jax.experimental import pallas as pl
from jax.experimental.pallas import tpu as pltpu


def _round_up(x: int, m: int) -> int:
    return ((x + m - 1) // m) * m


def _round_down(x: int, m: int) -> int:
    return (x // m) * m


def highway2_kernel(x_ref, wt_ref, b_ref, o_ref):
    """Fused 2-layer Highway on a (TN, D) tile of rows.

    x_ref : (TN, D)        input rows (any float dtype)
    wt_ref: (2, D, 2D)     per-layer [Wl^T || Wg^T] (bf16, resident in VMEM)
    b_ref : (2, 2D)        per-layer [bl || bg]     (f32,  resident in VMEM)
    o_ref : (TN, D)
    """
    D = x_ref.shape[-1]
    h = x_ref[...].astype(jnp.float32)

    def layer(h, k):
        # Single fused matmul per layer: (TN, D) @ (D, 2D) -> (TN, 2D), f32 acc.
        lg = jnp.dot(h.astype(wt_ref.dtype), wt_ref[k],
                     preferred_element_type=jnp.float32)
        lg = lg + b_ref[k:k + 1, :].astype(jnp.float32)
        lin = lg[:, :D]
        gpre = lg[:, D:]
        gate = jax.nn.sigmoid(gpre)        # EUP
        nonlin = jnp.maximum(lin, 0.0)     # VPU
        return h + gate * (nonlin - h)     # 3 VALU ops instead of 4

    h = layer(h, 0)
    h = layer(h, 1)
    o_ref[...] = h.astype(o_ref.dtype)


def prepare_highway_params(wl0, bl0, wg0, bg0, wl1, bl1, wg1, bg1,
                           matmul_dtype=jnp.bfloat16):
    """One-time parameter prep (hoisted out of the per-forward path).

    PyTorch nn.Linear weights are (out, in); transpose to (in, out) and concat
    [linear || gate] along the output axis so each layer is one (D, 2D) matmul.
    """
    wt = jnp.stack([
        jnp.concatenate([wl0.T, wg0.T], axis=1),
        jnp.concatenate([wl1.T, wg1.T], axis=1),
    ]).astype(matmul_dtype)                     # (2, D, 2D)
    bs = jnp.stack([
        jnp.concatenate([bl0, bg0]),
        jnp.concatenate([bl1, bg1]),
    ]).astype(jnp.float32)                      # (2, 2D)
    return wt, bs


def embedding_forward(x, wt, bs, *, block_rows=2048):
    """Embedding.forward: 2-layer Highway over the last dim.

    x : (B, L, D); wt/bs from prepare_highway_params. Returns (B, L, D).
    """
    B, L, D = x.shape
    N = B * L
    x2 = x.reshape(N, D)                        # free reshape (no HBM copy)
    itemsize = x2.dtype.itemsize

    # Row tile: multiple of 8 sublanes.  Cap so that
    #  (a) the "parallel" row axis has >= 2 grid steps (v7x: both TCs busy),
    #  (b) 2x(in+out) tiles + f32 (TN, 2D) intermediates fit ~40 MiB.
    TN = max(8, min(_round_up(block_rows, 8), _round_up(pl.cdiv(N, 2), 8)))
    bytes_per_row = 4 * D * itemsize + 8 * D * 4
    max_tn = max(8, _round_down((40 << 20) // bytes_per_row, 8))
    TN = min(TN, max_tn)
    grid = (pl.cdiv(N, TN),)

    # VMEM budget: double-buffered activations, double-buffered (small) weights,
    # headroom for f32 intermediates.  >= 32 MiB so large tiles compile on
    # v5e's 16 MiB scoped default; <= 56 MiB to stay inside v7x's 64 MiB.
    vmem_need = (4 * TN * D * itemsize
                 + 2 * wt.size * wt.dtype.itemsize
                 + 2 * bs.size * bs.dtype.itemsize
                 + 4 * TN * 2 * D * 4
                 + (4 << 20))
    vmem_limit = int(min(max(vmem_need, 32 << 20), 56 << 20))

    out = pl.pallas_call(
        highway2_kernel,
        out_shape=jax.ShapeDtypeStruct((N, D), x.dtype),
        grid_spec=pl.GridSpec(
            grid=grid,
            in_specs=[
                pl.BlockSpec((TN, D), lambda i: (i, 0)),          # row tile
                pl.BlockSpec((2, D, 2 * D), lambda i: (0, 0, 0)),  # weights (resident)
                pl.BlockSpec((2, 2 * D), lambda i: (0, 0)),        # biases  (resident)
            ],
            out_specs=pl.BlockSpec((TN, D), lambda i: (i, 0)),
        ),
        compiler_params=pltpu.CompilerParams(
            dimension_semantics=("parallel",),
            vmem_limit_bytes=vmem_limit,
        ),
    )(x2, wt, bs)

    return out.reshape(B, L, D)                 # free reshape (no HBM copy)


def embedding_reference(x, wl0, bl0, wg0, bg0, wl1, bl1, wg1, bg1):
    # Plain-JAX reference mirroring the (intended) PyTorch module exactly, f32.
    def layer(h, wl, bl, wg, bg):
        gate = jax.nn.sigmoid(h @ wg.T + bg)
        nonlin = jax.nn.relu(h @ wl.T + bl)
        return gate * nonlin + (1.0 - gate) * h

    h = layer(x, wl0, bl0, wg0, bg0)
    h = layer(h, wl1, bl1, wg1, bg1)
    return h


if __name__ == "__main__":
    # Small shapes consistent with the module: batch=2, seq=8, d_word=32.
    B, SEQ, D_WORD = 2, 8, 32

    key = jax.random.PRNGKey(0)
    keys = jax.random.split(key, 9)
    x = jax.random.normal(keys[0], (B, SEQ, D_WORD), dtype=jnp.float32)

    # Deterministic "nn.Linear"-style init: uniform in +/- 1/sqrt(fan_in).
    lim = 1.0 / (D_WORD ** 0.5)

    def linear_params(kw, kb):
        w = jax.random.uniform(kw, (D_WORD, D_WORD), jnp.float32, -lim, lim)
        b = jax.random.uniform(kb, (D_WORD,), jnp.float32, -lim, lim)
        return w, b

    wl0, bl0 = linear_params(keys[1], keys[2])   # Highway.linear[0]
    wg0, bg0 = linear_params(keys[3], keys[4])   # Highway.gate[0]
    wl1, bl1 = linear_params(keys[5], keys[6])   # Highway.linear[1]
    wg1, bg1 = linear_params(keys[7], keys[8])   # Highway.gate[1]

    # One-time weight prep (bf16 for the MXU), then the fused forward.
    wt, bs = prepare_highway_params(wl0, bl0, wg0, bg0, wl1, bl1, wg1, bg1)
    out = embedding_forward(x, wt, bs)           # N=16 -> TN=8, 2-step parallel grid
    out = jax.block_until_ready(out)

    ref = embedding_reference(x, wl0, bl0, wg0, bg0, wl1, bl1, wg1, bg1)
    assert out.shape == (B, SEQ, D_WORD), out.shape
    # bf16 matmul inputs (f32 accumulation) -> loosened tolerance vs f32 reference.
    assert jnp.allclose(out, ref, atol=3e-2, rtol=3e-2), "mismatch vs reference"

    print("KERNEL_OK")
</pallas_src>

<mosaic_0001>
module attributes {stable_mosaic.version = 11 : i64} {
  func.func @highway2_kernel(%arg0: i32, %arg1: memref<8x32xf32, #tpu.memory_space<vmem>>, %arg2: memref<2x32x64xbf16, #tpu.memory_space<vmem>>, %arg3: memref<2x64xf32, #tpu.memory_space<vmem>>, %arg4: memref<8x32xf32, #tpu.memory_space<vmem>>) attributes {dimension_semantics = [#tpu.dimension_semantics<parallel>], iteration_bounds = array<i64: 2>, scalar_prefetch = 0 : i64, scratch_operands = 0 : i64, tpu.core_type = #tpu.core_type<tc>, window_params = [{transform_indices = @transform_0, window_bounds = array<i64: 8, 32>}, {pipeline_mode = #tpu.pipeline_mode<synchronous>, transform_indices = @transform_1, window_bounds = array<i64: 2, 32, 64>}, {pipeline_mode = #tpu.pipeline_mode<synchronous>, transform_indices = @transform_2, window_bounds = array<i64: 2, 64>}, {transform_indices = @transform_3, window_bounds = array<i64: 8, 32>}]} {
    %c0 = arith.constant 0 : index
    %c0_0 = arith.constant 0 : index
    %0 = vector.load %arg1[%c0, %c0_0] : memref<8x32xf32, #tpu.memory_space<vmem>>, vector<8x32xf32>
    %1 = arith.truncf %0 : vector<8x32xf32> to vector<8x32xbf16>
    %c0_1 = arith.constant 0 : index
    %c0_2 = arith.constant 0 : index
    %c0_3 = arith.constant 0 : index
    %2 = vector.load %arg2[%c0_1, %c0_2, %c0_3] : memref<2x32x64xbf16, #tpu.memory_space<vmem>>, vector<1x32x64xbf16>
    %3 = vector.shape_cast %2 : vector<1x32x64xbf16> to vector<32x64xbf16>
    %cst = arith.constant dense<0.000000e+00> : vector<8x64xf32>
    %4 = tpu.matmul %1, %3, %cst {dimension_numbers = #tpu.dot_dimension_numbers<[1], [0], [0], [1], [0, 0, 1, 1], [], []>} : vector<8x32xbf16>, vector<32x64xbf16>, vector<8x64xf32> -> vector<8x64xf32>
    %c0_4 = arith.constant 0 : index
    %c0_5 = arith.constant 0 : index
    %5 = vector.load %arg3[%c0_4, %c0_5] : memref<2x64xf32, #tpu.memory_space<vmem>>, vector<1x64xf32>
    %6 = vector.broadcast %5 : vector<1x64xf32> to vector<8x64xf32>
    %7 = arith.addf %4, %6 : vector<8x64xf32>
    %8 = vector.extract_strided_slice %7 {offsets = [0, 0], sizes = [8, 32], strides = [1, 1]} : vector<8x64xf32> to vector<8x32xf32>
    %9 = vector.extract_strided_slice %7 {offsets = [0, 32], sizes = [8, 32], strides = [1, 1]} : vector<8x64xf32> to vector<8x32xf32>
    %10 = arith.negf %9 : vector<8x32xf32>
    %11 = math.exp %10 : vector<8x32xf32>
    %cst_6 = arith.constant 1.000000e+00 : f32
    %12 = vector.broadcast %cst_6 : f32 to vector<8x32xf32>
    %13 = arith.addf %12, %11 : vector<8x32xf32>
    %14 = arith.divf %12, %13 : vector<8x32xf32>
    %cst_7 = arith.constant 0.000000e+00 : f32
    %15 = vector.broadcast %cst_7 : f32 to vector<8x32xf32>
    %16 = arith.maximumf %8, %15 : vector<8x32xf32>
    %17 = arith.subf %16, %0 : vector<8x32xf32>
    %18 = arith.mulf %14, %17 : vector<8x32xf32>
    %19 = arith.addf %0, %18 : vector<8x32xf32>
    %20 = arith.truncf %19 : vector<8x32xf32> to vector<8x32xbf16>
    %c1 = arith.constant 1 : index
    %c0_8 = arith.constant 0 : index
    %c0_9 = arith.constant 0 : index
    %21 = vector.load %arg2[%c1, %c0_8, %c0_9] : memref<2x32x64xbf16, #tpu.memory_space<vmem>>, vector<1x32x64xbf16>
    %22 = vector.shape_cast %21 : vector<1x32x64xbf16> to vector<32x64xbf16>
    %cst_10 = arith.constant dense<0.000000e+00> : vector<8x64xf32>
    %23 = tpu.matmul %20, %22, %cst_10 {dimension_numbers = #tpu.dot_dimension_numbers<[1], [0], [0], [1], [0, 0, 1, 1], [], []>} : vector<8x32xbf16>, vector<32x64xbf16>, vector<8x64xf32> -> vector<8x64xf32>
    %c1_11 = arith.constant 1 : index
    %c0_12 = arith.constant 0 : index
    %24 = vector.load %arg3[%c1_11, %c0_12] : memref<2x64xf32, #tpu.memory_space<vmem>>, vector<1x64xf32>
    %25 = vector.broadcast %24 : vector<1x64xf32> to vector<8x64xf32>
    %26 = arith.addf %23, %25 : vector<8x64xf32>
    %27 = vector.extract_strided_slice %26 {offsets = [0, 0], sizes = [8, 32], strides = [1, 1]} : vector<8x64xf32> to vector<8x32xf32>
    %28 = vector.extract_strided_slice %26 {offsets = [0, 32], sizes = [8, 32], strides = [1, 1]} : vector<8x64xf32> to vector<8x32xf32>
    %29 = arith.negf %28 : vector<8x32xf32>
    %30 = math.exp %29 : vector<8x32xf32>
    %cst_13 = arith.constant 1.000000e+00 : f32
    %31 = vector.broadcast %cst_13 : f32 to vector<8x32xf32>
    %32 = arith.addf %31, %30 : vector<8x32xf32>
    %33 = arith.divf %31, %32 : vector<8x32xf32>
    %cst_14 = arith.constant 0.000000e+00 : f32
    %34 = vector.broadcast %cst_14 : f32 to vector<8x32xf32>
    %35 = arith.maximumf %27, %34 : vector<8x32xf32>
    %36 = arith.subf %35, %19 : vector<8x32xf32>
    %37 = arith.mulf %33, %36 : vector<8x32xf32>
    %38 = arith.addf %19, %37 : vector<8x32xf32>
    %c0_15 = arith.constant 0 : index
    %c0_16 = arith.constant 0 : index
    %39 = vector.load %arg4[%c0_15, %c0_16] : memref<8x32xf32, #tpu.memory_space<vmem>>, vector<8x32xf32>
    tpu.vector_store %arg4[%c0_15, %c0_16], %38 {strides = array<i32>} : memref<8x32xf32, #tpu.memory_space<vmem>>, vector<8x32xf32>,
    return
  }
  func.func @transform_0(%arg0: i32) -> (i32, i32) {
    %c0_i32 = arith.constant 0 : i32
    %c0_i32_0 = arith.constant 0 : i32
    return %arg0, %c0_i32 : i32, i32
  }
  func.func @transform_1(%arg0: i32) -> (i32, i32, i32) {
    %c0_i32 = arith.constant 0 : i32
    %c0_i32_0 = arith.constant 0 : i32
    %c0_i32_1 = arith.constant 0 : i32
    %c0_i32_2 = arith.constant 0 : i32
    return %c0_i32, %c0_i32_0, %c0_i32_1 : i32, i32, i32
  }
  func.func @transform_2(%arg0: i32) -> (i32, i32) {
    %c0_i32 = arith.constant 0 : i32
    %c0_i32_0 = arith.constant 0 : i32
    %c0_i32_1 = arith.constant 0 : i32
    return %c0_i32, %c0_i32_0 : i32, i32
  }
  func.func @transform_3(%arg0: i32) -> (i32, i32) {
    %c0_i32 = arith.constant 0 : i32
    %c0_i32_0 = arith.constant 0 : i32
    return %arg0, %c0_i32 : i32, i32
  }
}

</mosaic_0001>

<bundles_post_ra>
// kernel: tpu_custom_call.1
= control target key start
LH: loop header
LB: loop body
LE: loop exit
PB: predicated region body
PF: predicated region fallthrough
CT: control target
= control target key end

     0   :  { %8 = vsyncpa [#allocation3], 0  ;;  %s907_s0 = inlined_call_operand.hbm [shape: f32[16,32], index: 0, kind: input, shape index: {}]   ;;  %s908_s1 = inlined_call_operand.hbm [shape: bf16[2,32,64], index: 1, kind: input, shape index: {}]   ;;  %s909_s2 = inlined_call_operand.vmem [shape: f32[2,64], index: 2, kind: input, shape index: {}]   ;;  %s910_s3 = inlined_call_operand.hbm [shape: f32[16,32], index: 3, kind: output, shape index: {}]  }
   0x1   :  { %10 = vsyncpa [#allocation3 + $0x1], 0 }
   0x2   :  { %11 = vsyncpa [#allocation6], 0 }
   0x3   :  { %12 = vsyncpa [#allocation4], 0 }
   0x4   :  { %14 = vsyncpa [#allocation4 + $0x1], 0  ;;  %s740_s12 = smov 0   ;;  %s742_s13 = smov 0  }
   0x5   :  { %s744_s14 = smov 0   ;;  %s746_s15 = smov 0  }
   0x6 LB: > { %s761_s16 = sadd.s32 4294967295, %s709_s15   ;;  %s466_s17 = sadd.s32 4294967294, %s709_s15   ;;  %s709_s15 = sphi %s746_s15, %s932_s15   ;;  %s705_s14 = sphi %s744_s14, %s931_s14   ;;  %s701_s13 = sphi %s742_s13, %s930_s13   ;;  %s697_s12 = sphi %s740_s12, %s929_s12  }
   0x7   : > { %p40_p0 = scmp.ne.s32.totalorder %s701_s13, %s697_s12  ;;  %p911_p1 = scmp.eq.s32.totalorder %s761_s16, 0 }
   0x8   : > { %p112_p3 = scmp.eq.s32.totalorder %s466_s17, 1  ;;  %p467_p5 = scmp.ge.s32.totalorder %s709_s15, 1 }
   0x9   : > { %p770_p4 = por %p911_p1, %p40_p0  ;;  %p119_p7 = scmp.lt.s32.totalorder %s709_s15, 3 }
   0xa   : > { %p775_p6 = por %p112_p3, %p40_p0  ;;  %s711_s21 = smov [#allocation5]  }
   0xb   : > { %s915_s18 = scalar_select %p770_p4, 1, 0 }
   0xc   : > { %s916_s19 = scalar_select %p775_p6, 1, 0 }
   0xd   : > { %p780_p8 = pnand %p467_p5, %p119_p7  ;;  %s131_s22 = sshll.u32 %s711_s21, 4  ;;  %s132_s22 = int_to_ptr.vmem [resolvable:$true] %s131_s22 }
   0xe   : > { %s794_s24 = sadd.s32 1, %s709_s15   ;;  %s27_s25 = sadd.s32 1, %s705_s14 }
   0xf   : > { %s917_s20 = scalar_select %p780_p8, 1, 0 }
  0x10   : > { %p520_p9 = pneg %p780_p8  ;;  %s24_s26 = ssub.s32 %s709_s15, %s794_s24 }
  0x11   : > { %s598_s27 = scalar_lea.vmem %s132_s22, 512  ;;  %p606_p5 = scmp.lt.s32.totalorder %s132_s22, %s132_s22 }
  0x12   : > { %p789_p11 = pnand %p520_p9, %p911_p1  ;;  %p599_p13 = scmp.ne.s32.totalorder %s132_s22, %s598_s27 }
  0x13   : > { %p607_p7 = scmp.lt.s32.totalorder %s598_s27, %s598_s27 }
  0x14   : > { %p589_p12 = pneg %p789_p11 }
  0x15   : > { %p608_p10 = por %p607_p7, %p606_p5 }
  0x16   : > { %p601_p0 = pnand %p599_p13, %p589_p12 }
  0x18   : > { %p602_p3 = pneg %p601_p0 }
  0x1a   : > { %p609_p2 = pnand %p608_p10, %p602_p3 }
  0x1c   : > { %612 = shalt.err (!%p609_p2)
}
  0x1d   : > { %s712_s28 = smov 64   ;;  %s713_s29 = smov 4  }
  0x1e   : > { %523 = dma.hbm_to_vmem [thread:$0]  (!%p789_p11), %s908_s1, 512, %s132_s22, [#allocation6], %s712_s28, %s712_s28, %s713_s29  }
  0x1f   : > { %p25_p9 = scmp.eq.s32.totalorder %s24_s26, 0  ;;  %p34_p12 = scmp.ne.s32.totalorder %s705_s14, %s701_s13 }
  0x20   : > { %p35_p10 = scmp.eq.s32.totalorder %s709_s15, 0  ;;  %p533_p2 = scmp.lt.s32.totalorder %s709_s15, 2 }
  0x21   : > { %s811_s5 = scalar_select %p25_p9, %s705_s14, %s27_s25  }
  0x22   : > { %p36_p13 = por %p35_p10, %p34_p12  ;;  %p919_p0 = scmp.eq.s32.totalorder %s761_s16, 1 }
  0x23   : > { %s148_s7 = sand.u32 1, %s705_s14   ;;  %s471_s8 = sshll.u32 %s709_s15, 7 }
  0x24   : > { %p815_p3 = por %p919_p0, %p34_p12  ;;  %s470_s9 = sshll.u32 %s148_s7, 3 }
  0x25   : > { %s824_s17 = scalar_lea.hbm %s907_s0, %s471_s8  ;;  %s152_s21 = scalar_lea.vmem [#allocation2], %s470_s9 }
  0x26   : > { %s920_s6 = scalar_select %p815_p3, 1, 0 }
  0x27   : > { %s159_s22 = sshll.u32 %s152_s21, 4  ;;  %p826_p11 = pnand %p533_p2, %p36_p13  ;;  %s160_s22 = int_to_ptr.vmem [resolvable:$true] %s159_s22 }
  0x28   : > { %s149_s25 = scalar_lea.sflag [#allocation3], %s148_s7  ;;  %s613_s26 = scalar_lea.hbm %s824_s17, 128 }
  0x29   : > { %p614_p5 = scmp.ne.s32.totalorder %s824_s17, %s613_s26  ;;  %p615_p7 = pneg %p826_p11 }
  0x2a   : > { %s618_s29 = scalar_lea.hbm %s907_s0, 256  ;;  %p619_p10 = scmp.lt.s32.totalorder %s824_s17, %s907_s0 }
  0x2b   : > { %p616_p9 = pnand %p615_p7, %p614_p5  ;;  %p620_p2 = scmp.lt.s32.totalorder %s618_s29, %s613_s26 }
  0x2d   : > { %p617_p12 = pneg %p616_p9  ;;  %p621_p13 = por %p620_p2, %p619_p10 }
  0x2f   : > { %p622_p0 = pnand %p621_p13, %p617_p12 }
  0x31   : > { %625 = shalt.err (!%p622_p0)
}
  0x32   : > { %s626_s8 = scalar_lea.vmem %s160_s22, 128  ;;  %s714_s7 = smov [#allocation2]  }
  0x33   : > { %p627_p1 = scmp.ne.s32.totalorder %s160_s22, %s626_s8  ;;  %s631_s9 = sshll.u32 %s714_s7, 4  ;;  %s632_s9 = int_to_ptr.vmem [resolvable:$false] %s631_s9 }
  0x34   : > { %s633_s10 = scalar_lea.vmem %s632_s9, 256  ;;  %p634_p5 = scmp.lt.s32.totalorder %s160_s22, %s632_s9 }
  0x35   : > { %p629_p6 = pnand %p627_p1, %p615_p7  ;;  %p635_p9 = scmp.lt.s32.totalorder %s633_s10, %s626_s8 }
  0x37   : > { %p630_p3 = pneg %p629_p6  ;;  %p636_p4 = por %p635_p9, %p634_p5 }
  0x39   : > { %p637_p8 = pnand %p636_p4, %p630_p3 }
  0x3b   : > { %640 = shalt.err (!%p637_p8)
}
  0x3c   : > { %527 = dma.hbm_to_vmem [thread:$0]  (!%p826_p11), %s824_s17, 128, %s160_s22, %s149_s25  }
  0x3d   : > { %p922_p12 = scmp.ne.s32.totalorder %s917_s20, 0 }
  0x3e   : > { %s847_s11 = sand.u32 (!%p922_p12), 1, %s701_s13   ;;  %p923_p1 = scmp.ne.s32.totalorder (!%p922_p12), %s915_s18, 0 }
  0x3f   : > { %168 = sbr.rel (%p922_p12) target bundleno = 963 (0x3c3), region = 32  ;;  %s473_s21 = sshll.u32 (!%p922_p12), %s847_s11, 3 }
  0x40   : > { %s171_s26 = scalar_lea.sflag (!%p922_p12), [#allocation3], %s847_s11  ;;  %s174_s27 = scalar_lea.vmem (!%p922_p12), [#allocation2], %s473_s21 }
  0x44   : > { %684 = dma.done.wait (%p923_p1), %s171_s26, 128  }
  0x45   : > { %686 = vsyncadd (%p923_p1), %s171_s26, 4294967168  ;;  %p924_p4 = scmp.eq.s32.totalorder %s761_s16, 0 }
  0x47   : > { %688 = dma.done.wait (%p924_p4), [#allocation6], 512   ;;  %p925_p6 = pmov %p924_p4 }
  0x48   : > { %v715_v0 = vmov 0.0   ;;  %vm716_vm0 = vmmov 0   ;;  %v575_v1 = vld [vmem:[#allocation5 + $0x8] sm:$0xff]   ;;  %v576_v2 = vld [vmem:[#allocation5] sm:$0xff]   ;;  %v202_v3 = vld [vmem:[%s174_s27] sm:$0xff]  ;;  %vm225_vm1 = vcmask 261120  }
  0x49   : > { %690 = vsyncadd (%p925_p6), [#allocation6], 4294966784  ;;  %496 = vmatprep.subr.bf16.mxu0 %v715_v0  ;;  %500 = vmatprep.mubr.msk.bf16.mxu0 %vm716_vm0, %v715_v0  ;;  %v203_v4 = vpack.c.bf16 %v202_v3, %v202_v3  ;;  %v577_v5 = vld [vmem:[#allocation5 + $0x18] sm:$0xff]   ;;  %v476_v6 = vld [vmem:[%s909_s2] ss:$0 sm:$0xff]  ;;  %s717_s17 = smov 32  }
  0x4a   : > { %504 = vmatprep.subr.bf16.mxu1 %v715_v0  ;;  %508 = vmatprep.mubr.msk.bf16.mxu1 %vm716_vm0, %v715_v0  ;;  %v578_v17 = vld [vmem:[#allocation5 + $0x10] sm:$0xff]   ;;  %s718_s22 = smov 96   ;;  %s487_s28 = sshll.u32 %s761_s16, 7 }
  0x4b   : > { %497 = vmatpush3.bf16.msra.mxu0 %v575_v1  ;;  %505 = vmatpush3.bf16.msra.mxu1 %v577_v5  ;;  %v481_v24 = vld [vmem:[%s909_s2 + $0x1] ss:$0 sm:$0xff]  ;;  %s200_s29 = scalar_lea.vmem [#allocation7], %s473_s21  ;;  %s384_s7 = scalar_lea.hbm %s910_s3, %s487_s28 }
  0x4c   : > { %498 = vmatprep.subr.bf16.mxu0 %v715_v0  ;;  %506 = vmatprep.subr.bf16.mxu1 %v715_v0  ;;  %s386_s30 = sshll.u32 %s200_s29, 4  ;;  %s373_s9 = scalar_lea.sflag [#allocation4], %s847_s11  ;;  %s387_s30 = int_to_ptr.vmem [resolvable:$true] %s386_s30 }
  0x4d   : > { %s641_s10 = scalar_lea.vmem %s387_s30, 128  ;;  %p926_p3 = scmp.ne.s32.totalorder %s920_s6, 0 }
  0x4e   : > { %p642_p8 = scmp.ne.s32.totalorder %s387_s30, %s641_s10  ;;  %s719_s26 = smov [#allocation7]  }
  0x4f   : > { %499 = vmatpush3.bf16.msra.mxu0 %v576_v2  ;;  %507 = vmatpush3.bf16.msra.mxu1 %v578_v17  ;;  %s645_s16 = sshll.u32 %s719_s26, 4  ;;  %s646_s16 = int_to_ptr.vmem [resolvable:$false] %s645_s16 }
  0x50   : > { %p643_p11 = pnand %p642_p8, %p926_p3  ;;  %s647_s21 = scalar_lea.vmem %s646_s16, 256 }
  0x51   : > { %p648_p10 = scmp.lt.s32.totalorder %s387_s30, %s646_s16  ;;  %p649_p2 = scmp.lt.s32.totalorder %s647_s21, %s641_s10 }
  0x52   : > { %501 = vmatmul.mubr.msk.bf16.vlgmr.msra.gmra.mxu0 %vm225_vm1, %v203_v4  ;;  %p644_p7 = pneg %p643_p11 }
  0x53   : > { %p650_p13 = por %p649_p2, %p648_p10 }
  0x55   : > { %p651_p0 = pnand %p650_p13, %p644_p7 }
 0x112   : > { %v263_v7 = vpop.f32.mrf.mxu0 }
 0x113   : > { %v264_v8 = vadd.f32 %v476_v6, %v263_v7 }
 0x114   : > { %v502_v9 = vpop.f32.mrf.mxu0 }
 0x115   : > { %v275_v10 = vmax.f32 %v264_v8, 0.0  ;;  %v480_v14 = vmul.f32 -1.442695, %v264_v8 }
 0x116   : > { %v266_v11 = vpop.f32.mrf.mxu0 }
 0x117   : > { %v276_v12 = vsub.f32 %v275_v10, %v202_v3  ;;  %579 = vpow2.f32 %v480_v14 }
 0x118   : > { %v503_v13 = vpop.f32.mrf.mxu0 }
 0x119   : > { %278 = vrot.lane.b32.xlu0 %v276_v12, %s717_s17 }
 0x124   : > { %v580_v15 = vpop.eup %579 }
 0x125   : > { %v272_v16 = vadd.f32 1.0, %v580_v15 }
 0x127   : > { %581 = vrcp.f32 %v272_v16 }
 0x134   : > { %v582_v18 = vpop.eup %581 }
 0x18b   : > { %v279_v19 = vpop.permute.xlu0 %278 }
 0x18c   : > { %v281_v20 = vmul.f32 %v582_v18, %v279_v19 }
 0x18e   : > { %283 = vrot.lane.b32.xlu0 %v281_v20, %s718_s22 }
 0x200   : > { %v284_v21 = vpop.permute.xlu0 %283 }
 0x201   : > { %v286_v22 = vadd.f32 %v284_v21, %v202_v3 }
 0x203   : > { %v287_v23 = vpack.c.bf16 %v286_v22, %v286_v22 }
 0x205   : > { %509 = vmatmul.mubr.msk.bf16.vlgmr.msra.gmra.mxu1 %vm225_vm1, %v287_v23 }
 0x2c5   : > { %v347_v25 = vpop.f32.mrf.mxu1 }
 0x2c6   : > { %v348_v26 = vadd.f32 %v481_v24, %v347_v25 }
 0x2c7   : > { %v510_v27 = vpop.f32.mrf.mxu1 }
 0x2c8   : > { %v359_v28 = vmax.f32 %v348_v26, 0.0  ;;  %v485_v32 = vmul.f32 -1.442695, %v348_v26 }
 0x2c9   : > { %v350_v29 = vpop.f32.mrf.mxu1 }
 0x2ca   : > { %v360_v30 = vsub.f32 %v359_v28, %v286_v22  ;;  %583 = vpow2.f32 %v485_v32 }
 0x2cb   : > { %v511_v31 = vpop.f32.mrf.mxu1 }
 0x2cc   : > { %362 = vrot.lane.b32.xlu1 %v360_v30, %s717_s17 }
 0x2d7   : > { %v584_v33 = vpop.eup %583 }
 0x2d8   : > { %v356_v34 = vadd.f32 1.0, %v584_v33 }
 0x2da   : > { %585 = vrcp.f32 %v356_v34 }
 0x2e7   : > { %v586_v35 = vpop.eup %585 }
 0x33e   : > { %v363_v36 = vpop.permute.xlu1 %362 }
 0x33f   : > { %v365_v37 = vmul.f32 %v586_v35, %v363_v36 }
 0x341   : > { %367 = vrot.lane.b32.xlu1 %v365_v37, %s718_s22 }
 0x3b3   : > { %v368_v38 = vpop.permute.xlu1 %367 }
 0x3b4   : > { %v370_v39 = vadd.f32 %v368_v38, %v286_v22 }
 0x3b6   : > { %371 = vst.msk [vmem:[%s200_s29] sm:$0xff] %vm225_vm1, %v370_v39 }
 0x3b7   : > { %654 = shalt.err (!%p651_p0)
}
 0x3b8   : > { %s655_s27 = scalar_lea.hbm %s384_s7, 128  ;;  %s659_s20 = scalar_lea.hbm %s910_s3, 256 }
 0x3b9   : > { %p656_p5 = scmp.ne.s32.totalorder %s384_s7, %s655_s27  ;;  %p660_p1 = scmp.lt.s32.totalorder %s384_s7, %s910_s3 }
 0x3ba   : > { %p661_p4 = scmp.lt.s32.totalorder %s659_s20, %s655_s27 }
 0x3bb   : > { %p657_p9 = pnand %p656_p5, %p926_p3 }
 0x3bc   : > { %p662_p6 = por %p661_p4, %p660_p1 }
 0x3bd   : > { %p658_p12 = pneg %p657_p9 }
 0x3bf   : > { %p663_p8 = pnand %p662_p6, %p658_p12 }
 0x3c1   : > { %666 = shalt.err (!%p663_p8)
}
 0x3c2   : > { %518 = dma.vmem_to_hbm [thread:$0]  (%p926_p3), %s387_s30, 128, %s384_s7, %s373_s9  }
 0x3c3 PF: > { %s398_s23 = sand.u32 1, %s697_s12   ;;  %p927_p11 = scmp.ne.s32.totalorder %s916_s19, 0 }
 0x3c4   : > { %p928_p7 = scmp.ge.s32.totalorder %s709_s15, 2  ;;  %s399_s25 = scalar_lea.sflag [#allocation4], %s398_s23 }
 0x3c6   : > { %p529_p10 = pnand %p928_p7, %p927_p11 }
 0x3c8   : > { %p530_p2 = pneg %p529_p10 }
 0x3ca   : > { %692 = dma.done.wait (%p530_p2), %s399_s25, 128  }
 0x3cb   : > { %694 = vsyncadd (%p530_p2), %s399_s25, 4294967168  ;;  %p17_p13 = scmp.ge.s32.totalorder %s794_s24, 4   ;;  %s929_s12 = smov %s701_s13 }
 0x3cc   : > { %s930_s13 = smov %s705_s14  ;;  %s931_s14 = smov %s811_s5 }
 0x3cd   : > { %s932_s15 = smov %s794_s24  ;;  %19 = sbr.rel (!%p17_p13) target bundleno = 6 (0x6), region = 82 }
 0x3d2   :  { %404 = vsyncpa [#allocation3], 1 }
 0x3d3   :  { %406 = vsyncpa [#allocation3 + $0x1], 1 }
 0x3d4   :  { %407 = vsyncpa [#allocation6], 1 }
 0x3d5   :  { %408 = vsyncpa [#allocation4], 1 }
 0x3d6   :  { %410 = vsyncpa [#allocation4 + $0x1], 1 }

</bundles_post_ra>
